<compile_context>
chip_gen: v7x
topology: tpu7x:2x2x1
jax: 0.10.0
libtpu: 0.0.40
codegen_flags: <defaults>
</compile_context>

<pallas_src>
import jax
import jax.numpy as jnp
from jax.experimental import pallas as pl
from jax.experimental.pallas import tpu as pltpu


# ---------------------------------------------------------------------------
# Kernels
# ---------------------------------------------------------------------------

def _rb_proj_kernel(x_ref, w1_ref, b1_ref, w2_ref, wr_ref, bout_ref, o_ref):
    """Residual block with linear residual projection (input_dim != encode_dim)."""
    x = x_ref[...]                                            # (TB, Dp) compute dtype
    h = jnp.dot(x, w1_ref[...], preferred_element_type=jnp.float32) + b1_ref[...]
    h = jnp.maximum(h, 0.0).astype(x.dtype)                   # f32 ReLU, repack for MXU
    acc = jnp.dot(h, w2_ref[...], preferred_element_type=jnp.float32)
    acc = acc + jnp.dot(x, wr_ref[...], preferred_element_type=jnp.float32)
    out = acc + bout_ref[...]                                 # folded (b2 + br), f32
    o_ref[...] = jnp.maximum(out, 0.0).astype(o_ref.dtype)


def _rb_ident_kernel(x_ref, w1_ref, b1_ref, w2_ref, bout_ref, o_ref):
    """Residual block with identity residual (input_dim == encode_dim)."""
    x = x_ref[...]
    h = jnp.dot(x, w1_ref[...], preferred_element_type=jnp.float32) + b1_ref[...]
    h = jnp.maximum(h, 0.0).astype(x.dtype)
    acc = jnp.dot(h, w2_ref[...], preferred_element_type=jnp.float32)
    acc = acc + x.astype(jnp.float32)                         # identity residual, f32
    out = acc + bout_ref[...]
    o_ref[...] = jnp.maximum(out, 0.0).astype(o_ref.dtype)


# ---------------------------------------------------------------------------
# Helpers
# ---------------------------------------------------------------------------

def _round_up(n, m):
    return ((n + m - 1) // m) * m


def _cdiv(a, b):
    return -(-a // b)


def _pad2(a, rows, cols):
    return jnp.pad(a, ((0, rows - a.shape[0]), (0, cols - a.shape[1])))


def _resident_spec(shape):
    """Constant-index weight/bias block; single-buffered when supported."""
    idx = lambda i: (0, 0)
    try:
        return pl.BlockSpec(shape, idx, pipeline_mode=pl.Buffered(1))
    except (TypeError, AttributeError):
        # Older jax without pipeline_mode / Buffered: fall back to default (2x).
        return pl.BlockSpec(shape, idx)


def _choose_batch_tiling(B, Dp, Hp, Ep, has_proj, w_itemsize, x_itemsize,
                         out_itemsize, block_b):
    """Pick (TB, Bp, vmem_limit_bytes) under a v7x-safe VMEM budget."""
    budget = 40 * 1024 * 1024          # conservative: headroom on 64 MiB v7x VMEM
    weight_bytes = ((Dp * Hp + Hp * Ep + (Dp * Ep if has_proj else 0)) * w_itemsize
                    + (Hp + Ep) * 4)
    # Per batch-row: double-buffered x / out tiles + in-kernel f32 temporaries.
    per_row = 2 * Dp * x_itemsize + 2 * Ep * out_itemsize + (Dp + Hp + Ep) * 4
    # Assume weights could be double-buffered if Buffered(1) is unavailable.
    avail = budget - 2 * weight_bytes
    if avail < 8 * per_row:
        # TODO(synk): weights alone exceed the per-core VMEM budget -- would need
        # an extra K/N grid axis tiling W1/W2/Wr (not needed at these dims).
        max_tb = 8
    else:
        max_tb = max(8, (avail // per_row) // 8 * 8)
    tb_target = max(8, min(block_b, max_tb))

    Bp8 = _round_up(max(B, 1), 8)
    n_tiles = _cdiv(Bp8, tb_target)
    if Bp8 >= 16:
        n_tiles = max(n_tiles, 2)      # >= 2 grid steps: both v7x TCs get work
    TB = _round_up(_cdiv(Bp8, n_tiles), 8)
    Bp = TB * n_tiles

    vmem_limit = int(min(60 * 1024 * 1024,
                         max(32 * 1024 * 1024,
                             2 * weight_bytes + per_row * TB + 8 * 1024 * 1024)))
    return TB, Bp, vmem_limit


# ---------------------------------------------------------------------------
# Parameter preparation (hoisted padding / casting / bias folding)
# ---------------------------------------------------------------------------

def prepare_params(params, *, compute_dtype=jnp.bfloat16):
    """Pad to lane-dense (x128) dims, cast weights, and fold biases -- once."""
    input_dim, hidden_dim = params["w1"].shape
    encode_dim = params["w2"].shape[1]
    has_proj = "wr" in params
    Dp, Hp, Ep = (_round_up(d, 128) for d in (input_dim, hidden_dim, encode_dim))

    prep = {
        "_prepared": True,
        "dims": (input_dim, hidden_dim, encode_dim, Dp, Hp, Ep),
        "has_proj": has_proj,
        "w1": _pad2(params["w1"], Dp, Hp).astype(compute_dtype),
        "b1": _pad2(params["b1"], 1, Hp).astype(jnp.float32),
        "w2": _pad2(params["w2"], Hp, Ep).astype(compute_dtype),
    }
    if has_proj:
        prep["wr"] = _pad2(params["wr"], Dp, Ep).astype(compute_dtype)
        prep["bout"] = _pad2(params["b2"] + params["br"], 1, Ep).astype(jnp.float32)
    else:
        prep["bout"] = _pad2(params["b2"], 1, Ep).astype(jnp.float32)
    return prep


# ---------------------------------------------------------------------------
# Wrapper
# ---------------------------------------------------------------------------

def residual_block(x, params, *, block_b=512, compute_dtype=jnp.bfloat16):
    """x: (B, input_dim).  params: raw dict (from init_params) or prepare_params()
    output.  Returns (B, encode_dim) in x.dtype."""
    if not params.get("_prepared", False):
        params = prepare_params(params, compute_dtype=compute_dtype)

    input_dim, hidden_dim, encode_dim, Dp, Hp, Ep = params["dims"]
    has_proj = params["has_proj"]
    B = x.shape[0]
    assert x.shape[1] == input_dim
    if B == 0:
        return jnp.zeros((0, encode_dim), x.dtype)

    cdt = params["w1"].dtype
    w_elt = jnp.dtype(cdt).itemsize
    out_elt = jnp.dtype(x.dtype).itemsize
    TB, Bp, vmem_limit = _choose_batch_tiling(
        B, Dp, Hp, Ep, has_proj, w_elt, w_elt, out_elt, block_b)

    xp = _pad2(x, Bp, Dp).astype(cdt)

    grid = (Bp // TB,)
    x_spec = pl.BlockSpec((TB, Dp), lambda i: (i, 0))
    o_spec = pl.BlockSpec((TB, Ep), lambda i: (i, 0))

    flops = 2 * Bp * (Dp * Hp + Hp * Ep + (Dp * Ep if has_proj else 0))
    bytes_accessed = ((Dp * Hp + Hp * Ep + (Dp * Ep if has_proj else 0)) * w_elt
                      + Bp * Dp * w_elt + Bp * Ep * out_elt)

    if has_proj:
        kernel = _rb_proj_kernel
        args = (xp, params["w1"], params["b1"], params["w2"], params["wr"],
                params["bout"])
        in_specs = [x_spec, _resident_spec((Dp, Hp)), _resident_spec((1, Hp)),
                    _resident_spec((Hp, Ep)), _resident_spec((Dp, Ep)),
                    _resident_spec((1, Ep))]
    else:
        kernel = _rb_ident_kernel
        args = (xp, params["w1"], params["b1"], params["w2"], params["bout"])
        in_specs = [x_spec, _resident_spec((Dp, Hp)), _resident_spec((1, Hp)),
                    _resident_spec((Hp, Ep)), _resident_spec((1, Ep))]

    out_padded = pl.pallas_call(
        kernel,
        out_shape=jax.ShapeDtypeStruct((Bp, Ep), x.dtype),
        grid=grid,
        in_specs=in_specs,
        out_specs=o_spec,
        compiler_params=pltpu.CompilerParams(
            dimension_semantics=("parallel",),
            vmem_limit_bytes=vmem_limit,
        ),
        cost_estimate=pl.CostEstimate(
            flops=flops, bytes_accessed=bytes_accessed, transcendentals=0),
    )(*args)

    return out_padded[:B, :encode_dim]


# ---------------------------------------------------------------------------
# Params / reference
# ---------------------------------------------------------------------------

def init_params(key, input_dim, hidden_dim, encode_dim, dtype=jnp.float32):
    """Deterministic synthetic init (uniform, PyTorch-Linear-style bounds)."""
    keys = jax.random.split(key, 6)

    def linear(kw, kb, fan_in, fan_out):
        bound = 1.0 / jnp.sqrt(fan_in)
        w = jax.random.uniform(kw, (fan_in, fan_out), dtype, -bound, bound)
        b = jax.random.uniform(kb, (1, fan_out), dtype, -bound, bound)
        return w, b

    w1, b1 = linear(keys[0], keys[1], input_dim, hidden_dim)
    w2, b2 = linear(keys[2], keys[3], hidden_dim, encode_dim)
    params = {"w1": w1, "b1": b1, "w2": w2, "b2": b2}
    if input_dim != encode_dim:
        wr, br = linear(keys[4], keys[5], input_dim, encode_dim)
        params["wr"] = wr
        params["br"] = br
    return params


def residual_block_ref(x, params):
    """Pure-JAX reference for correctness check."""
    h = jnp.maximum(x @ params["w1"] + params["b1"], 0.0)
    out = h @ params["w2"] + params["b2"]
    res = x @ params["wr"] + params["br"] if "wr" in params else x
    return jnp.maximum(out + res, 0.0)


# ---------------------------------------------------------------------------
# Demo / self-test
# ---------------------------------------------------------------------------

if __name__ == "__main__":
    key = jax.random.PRNGKey(0)
    k_x, k_x2, k_p, k_p2 = jax.random.split(key, 4)

    batch, input_dim, hidden_dim, encode_dim = 8, 16, 32, 24
    x = jax.random.normal(k_x, (batch, input_dim), jnp.float32)

    # Case 1: projection residual (input_dim != encode_dim), exact f32 path.
    params = init_params(k_p, input_dim, hidden_dim, encode_dim)
    ref = residual_block_ref(x, params)
    out = jax.block_until_ready(residual_block(x, params, compute_dtype=jnp.float32))
    assert out.shape == (batch, encode_dim)
    assert jnp.allclose(out, ref, atol=1e-5, rtol=1e-5)

    # Case 2: identity residual (input_dim == encode_dim), exact f32 path.
    params_id = init_params(k_p2, input_dim, hidden_dim, input_dim)
    ref_id = residual_block_ref(x, params_id)
    out_id = jax.block_until_ready(
        residual_block(x, params_id, compute_dtype=jnp.float32))
    assert out_id.shape == (batch, input_dim)
    assert jnp.allclose(out_id, ref_id, atol=1e-5, rtol=1e-5)

    # Case 3: default bf16 MXU path (f32 accumulation), hoisted weight prep,
    # odd batch exercising the 2-step "parallel" grid and batch padding.
    prepared = prepare_params(params)                  # pad / cast / fold once
    x_odd = jax.random.normal(k_x2, (13, input_dim), jnp.float32)
    ref_odd = residual_block_ref(x_odd, params)
    out_odd = jax.block_until_ready(residual_block(x_odd, prepared))
    out_odd2 = jax.block_until_ready(residual_block(x_odd, prepared))  # reuse prep
    assert out_odd.shape == (13, encode_dim)
    assert jnp.allclose(out_odd, ref_odd, atol=1e-1, rtol=1e-1)
    assert jnp.allclose(out_odd, out_odd2)

    print("KERNEL_OK")
</pallas_src>

<mosaic_0001>
module attributes {stable_mosaic.version = 11 : i64} {
  func.func @_rb_proj_kernel(%arg0: i32, %arg1: memref<8x128xf32, #tpu.memory_space<vmem>>, %arg2: memref<128x128xf32, #tpu.memory_space<vmem>>, %arg3: memref<1x128xf32, #tpu.memory_space<vmem>>, %arg4: memref<128x128xf32, #tpu.memory_space<vmem>>, %arg5: memref<128x128xf32, #tpu.memory_space<vmem>>, %arg6: memref<1x128xf32, #tpu.memory_space<vmem>>, %arg7: memref<8x128xf32, #tpu.memory_space<vmem>>) attributes {dimension_semantics = [#tpu.dimension_semantics<parallel>], iteration_bounds = array<i64: 1>, scalar_prefetch = 0 : i64, scratch_operands = 0 : i64, tpu.core_type = #tpu.core_type<tc>, window_params = [{transform_indices = @transform_0, window_bounds = array<i64: 8, 128>}, {pipeline_mode = #tpu.pipeline_mode<synchronous>, transform_indices = @transform_1, window_bounds = array<i64: 128, 128>}, {pipeline_mode = #tpu.pipeline_mode<synchronous>, transform_indices = @transform_2, window_bounds = array<i64: 1, 128>}, {pipeline_mode = #tpu.pipeline_mode<synchronous>, transform_indices = @transform_3, window_bounds = array<i64: 128, 128>}, {pipeline_mode = #tpu.pipeline_mode<synchronous>, transform_indices = @transform_4, window_bounds = array<i64: 128, 128>}, {pipeline_mode = #tpu.pipeline_mode<synchronous>, transform_indices = @transform_5, window_bounds = array<i64: 1, 128>}, {transform_indices = @transform_6, window_bounds = array<i64: 8, 128>}]} {
    %c0 = arith.constant 0 : index
    %c0_0 = arith.constant 0 : index
    %0 = vector.load %arg1[%c0, %c0_0] : memref<8x128xf32, #tpu.memory_space<vmem>>, vector<8x128xf32>
    %c0_1 = arith.constant 0 : index
    %c0_2 = arith.constant 0 : index
    %1 = vector.load %arg2[%c0_1, %c0_2] : memref<128x128xf32, #tpu.memory_space<vmem>>, vector<128x128xf32>
    %cst = arith.constant dense<0.000000e+00> : vector<8x128xf32>
    %2 = tpu.matmul %0, %1, %cst {dimension_numbers = #tpu.dot_dimension_numbers<[1], [0], [0], [1], [0, 0, 1, 1], [], []>} : vector<8x128xf32>, vector<128x128xf32>, vector<8x128xf32> -> vector<8x128xf32>
    %c0_3 = arith.constant 0 : index
    %c0_4 = arith.constant 0 : index
    %3 = vector.load %arg3[%c0_3, %c0_4] : memref<1x128xf32, #tpu.memory_space<vmem>>, vector<1x128xf32>
    %4 = vector.broadcast %3 : vector<1x128xf32> to vector<8x128xf32>
    %5 = arith.addf %2, %4 : vector<8x128xf32>
    %cst_5 = arith.constant 0.000000e+00 : f32
    %6 = vector.broadcast %cst_5 : f32 to vector<8x128xf32>
    %7 = arith.maximumf %5, %6 : vector<8x128xf32>
    %c0_6 = arith.constant 0 : index
    %c0_7 = arith.constant 0 : index
    %8 = vector.load %arg4[%c0_6, %c0_7] : memref<128x128xf32, #tpu.memory_space<vmem>>, vector<128x128xf32>
    %cst_8 = arith.constant dense<0.000000e+00> : vector<8x128xf32>
    %9 = tpu.matmul %7, %8, %cst_8 {dimension_numbers = #tpu.dot_dimension_numbers<[1], [0], [0], [1], [0, 0, 1, 1], [], []>} : vector<8x128xf32>, vector<128x128xf32>, vector<8x128xf32> -> vector<8x128xf32>
    %c0_9 = arith.constant 0 : index
    %c0_10 = arith.constant 0 : index
    %10 = vector.load %arg5[%c0_9, %c0_10] : memref<128x128xf32, #tpu.memory_space<vmem>>, vector<128x128xf32>
    %cst_11 = arith.constant dense<0.000000e+00> : vector<8x128xf32>
    %11 = tpu.matmul %0, %10, %cst_11 {dimension_numbers = #tpu.dot_dimension_numbers<[1], [0], [0], [1], [0, 0, 1, 1], [], []>} : vector<8x128xf32>, vector<128x128xf32>, vector<8x128xf32> -> vector<8x128xf32>
    %12 = arith.addf %9, %11 : vector<8x128xf32>
    %c0_12 = arith.constant 0 : index
    %c0_13 = arith.constant 0 : index
    %13 = vector.load %arg6[%c0_12, %c0_13] : memref<1x128xf32, #tpu.memory_space<vmem>>, vector<1x128xf32>
    %14 = vector.broadcast %13 : vector<1x128xf32> to vector<8x128xf32>
    %15 = arith.addf %12, %14 : vector<8x128xf32>
    %cst_14 = arith.constant 0.000000e+00 : f32
    %16 = vector.broadcast %cst_14 : f32 to vector<8x128xf32>
    %17 = arith.maximumf %15, %16 : vector<8x128xf32>
    %c0_15 = arith.constant 0 : index
    %c0_16 = arith.constant 0 : index
    %18 = vector.load %arg7[%c0_15, %c0_16] : memref<8x128xf32, #tpu.memory_space<vmem>>, vector<8x128xf32>
    tpu.vector_store %arg7[%c0_15, %c0_16], %17 {strides = array<i32>} : memref<8x128xf32, #tpu.memory_space<vmem>>, vector<8x128xf32>,
    return
  }
  func.func @transform_0(%arg0: i32) -> (i32, i32) {
    %c0_i32 = arith.constant 0 : i32
    %c0_i32_0 = arith.constant 0 : i32
    return %arg0, %c0_i32 : i32, i32
  }
  func.func @transform_1(%arg0: i32) -> (i32, i32) {
    %c0_i32 = arith.constant 0 : i32
    %c0_i32_0 = arith.constant 0 : i32
    %c0_i32_1 = arith.constant 0 : i32
    return %c0_i32, %c0_i32_0 : i32, i32
  }
  func.func @transform_2(%arg0: i32) -> (i32, i32) {
    %c0_i32 = arith.constant 0 : i32
    %c0_i32_0 = arith.constant 0 : i32
    %c0_i32_1 = arith.constant 0 : i32
    return %c0_i32, %c0_i32_0 : i32, i32
  }
  func.func @transform_3(%arg0: i32) -> (i32, i32) {
    %c0_i32 = arith.constant 0 : i32
    %c0_i32_0 = arith.constant 0 : i32
    %c0_i32_1 = arith.constant 0 : i32
    return %c0_i32, %c0_i32_0 : i32, i32
  }
  func.func @transform_4(%arg0: i32) -> (i32, i32) {
    %c0_i32 = arith.constant 0 : i32
    %c0_i32_0 = arith.constant 0 : i32
    %c0_i32_1 = arith.constant 0 : i32
    return %c0_i32, %c0_i32_0 : i32, i32
  }
  func.func @transform_5(%arg0: i32) -> (i32, i32) {
    %c0_i32 = arith.constant 0 : i32
    %c0_i32_0 = arith.constant 0 : i32
    %c0_i32_1 = arith.constant 0 : i32
    return %c0_i32, %c0_i32_0 : i32, i32
  }
  func.func @transform_6(%arg0: i32) -> (i32, i32) {
    %c0_i32 = arith.constant 0 : i32
    %c0_i32_0 = arith.constant 0 : i32
    return %arg0, %c0_i32 : i32, i32
  }
}

</mosaic_0001>

<bundles_post_ra>
// kernel: tpu_custom_call.1
= control target key start
LH: loop header
LB: loop body
LE: loop exit
PB: predicated region body
PF: predicated region fallthrough
CT: control target
= control target key end

     0   :  { %11 = vsyncpa [#allocation3], 0  ;;  %s879_s0 = inlined_call_operand.hbm [shape: f32[8,128], index: 0, kind: input, shape index: {}]   ;;  %s880_s1 = inlined_call_operand.hbm [shape: f32[128,128], index: 1, kind: input, shape index: {}]   ;;  %s881_s2 = inlined_call_operand.vmem [shape: f32[1,128], index: 2, kind: input, shape index: {}]   ;;  %s882_s3 = inlined_call_operand.hbm [shape: f32[128,128], index: 3, kind: input, shape index: {}]   ;;  %s883_s4 = inlined_call_operand.hbm [shape: f32[128,128], index: 4, kind: input, shape index: {}]   ;;  %s884_s5 = inlined_call_operand.vmem [shape: f32[1,128], index: 5, kind: input, shape index: {}]   ;;  %s885_s6 = inlined_call_operand.hbm [shape: f32[8,128], index: 6, kind: output, shape index: {}]  }
   0x1   :  { %12 = vsyncpa [#allocation6], 0 }
   0x2   :  { %13 = vsyncpa [#allocation9], 0 }
   0x3   :  { %14 = vsyncpa [#allocation4], 0  ;;  %s729_s21 = smov [#allocation5]   ;;  %s611_s25 = scalar_lea.hbm %s880_s1, 2048 }
   0x4   :  { %s30_s22 = sshll.u32 %s729_s21, 4  ;;  %p612_p0 = scmp.ne.s32.totalorder %s880_s1, %s611_s25  ;;  %s31_s22 = int_to_ptr.vmem [resolvable:$true] %s30_s22 }
   0x5   :  { %p615_p1 = scmp.lt.u32.totalorder %s611_s25, %s880_s1 }
   0x7   :  { %p617_p2 = pnand %p615_p1, %p612_p0 }
   0x9   :  { %620 = shalt.err (!%p617_p2)
}
   0xa   :  { %s621_s30 = scalar_lea.vmem %s31_s22, 2048  ;;  %p626_p4 = scmp.lt.s32.totalorder %s31_s22, %s31_s22 }
   0xb   :  { %p622_p3 = scmp.ne.s32.totalorder %s31_s22, %s621_s30  ;;  %p627_p5 = scmp.lt.s32.totalorder %s621_s30, %s621_s30 }
   0xd   :  { %p628_p6 = por %p627_p5, %p626_p4 }
   0xf   :  { %p629_p7 = pnand %p628_p6, %p622_p3 }
  0x11   :  { %632 = shalt.err (!%p629_p7)
}
  0x12   :  { %s730_s7 = smov 128   ;;  %s731_s8 = smov 8  }
  0x13   :  { %36 = dma.hbm_to_vmem [thread:$0]  %s880_s1, 2048, %s31_s22, [#allocation6], %s730_s7, %s730_s7, %s731_s8  }
  0x14   :  { %s732_s11 = smov [#allocation2]   ;;  %s733_s13 = smov [#allocation7]  }
  0x15   :  { %s21_s12 = sshll.u32 %s732_s11, 4  ;;  %s44_s14 = sshll.u32 %s733_s13, 4  ;;  %s22_s12 = int_to_ptr.vmem [resolvable:$true] %s21_s12  ;;  %s45_s14 = int_to_ptr.vmem [resolvable:$true] %s44_s14 }
  0x16   :  { %s633_s17 = scalar_lea.hbm %s879_s0, 128 }
  0x17   :  { %p634_p8 = scmp.ne.s32.totalorder %s879_s0, %s633_s17  ;;  %p637_p9 = scmp.lt.u32.totalorder %s633_s17, %s879_s0 }
  0x19   :  { %p639_p10 = pnand %p637_p9, %p634_p8 }
  0x1b   :  { %642 = shalt.err (!%p639_p10)
}
  0x1c   :  { %s643_s1 = scalar_lea.vmem %s22_s12, 128  ;;  %p648_p12 = scmp.lt.s32.totalorder %s22_s12, %s22_s12 }
  0x1d   :  { %p644_p11 = scmp.ne.s32.totalorder %s22_s12, %s643_s1  ;;  %p649_p13 = scmp.lt.s32.totalorder %s643_s1, %s643_s1 }
  0x1f   :  { %p650_p0 = por %p649_p13, %p648_p12 }
  0x21   :  { %p651_p1 = pnand %p650_p0, %p644_p11 }
  0x23   :  { %654 = shalt.err (!%p651_p1)
}
  0x24   :  { %24 = dma.hbm_to_vmem [thread:$0]  %s879_s0, 128, %s22_s12, [#allocation3]  }
  0x25   :  { %s655_s26 = scalar_lea.hbm %s882_s3, 2048 }
  0x26   :  { %p656_p2 = scmp.ne.s32.totalorder %s882_s3, %s655_s26  ;;  %p659_p3 = scmp.lt.u32.totalorder %s655_s26, %s882_s3 }
  0x28   :  { %p661_p4 = pnand %p659_p3, %p656_p2 }
  0x2a   :  { %664 = shalt.err (!%p661_p4)
}
  0x2b   :  { %s665_s9 = scalar_lea.vmem %s45_s14, 2048  ;;  %p670_p6 = scmp.lt.s32.totalorder %s45_s14, %s45_s14 }
  0x2c   :  { %p666_p5 = scmp.ne.s32.totalorder %s45_s14, %s665_s9  ;;  %p671_p7 = scmp.lt.s32.totalorder %s665_s9, %s665_s9 }
  0x2e   :  { %p672_p8 = por %p671_p7, %p670_p6 }
  0x30   :  { %p673_p9 = pnand %p672_p8, %p666_p5 }
  0x32   :  { %676 = shalt.err (!%p673_p9)
}
  0x33   :  { %50 = dma.hbm_to_vmem [thread:$0]  %s882_s3, 2048, %s45_s14, [#allocation6], %s730_s7, %s730_s7, %s731_s8  }
  0x34   :  { %s734_s11 = smov [#allocation8]   ;;  %s677_s16 = scalar_lea.hbm %s883_s4, 2048 }
  0x35   :  { %s56_s12 = sshll.u32 %s734_s11, 4  ;;  %p678_p10 = scmp.ne.s32.totalorder %s883_s4, %s677_s16  ;;  %s57_s12 = int_to_ptr.vmem [resolvable:$true] %s56_s12 }
  0x36   :  { %p681_p11 = scmp.lt.u32.totalorder %s677_s16, %s883_s4 }
  0x38   :  { %p683_p12 = pnand %p681_p11, %p678_p10 }
  0x3a   :  { %686 = shalt.err (!%p683_p12)
}
  0x3b   :  { %s687_s21 = scalar_lea.vmem %s57_s12, 2048  ;;  %p692_p0 = scmp.lt.s32.totalorder %s57_s12, %s57_s12 }
  0x3c   :  { %p688_p13 = scmp.ne.s32.totalorder %s57_s12, %s687_s21  ;;  %p693_p1 = scmp.lt.s32.totalorder %s687_s21, %s687_s21 }
  0x3e   :  { %p694_p2 = por %p693_p1, %p692_p0 }
  0x40   :  { %p695_p3 = pnand %p694_p2, %p688_p13 }
  0x42   :  { %698 = shalt.err (!%p695_p3)
}
  0x43   :  { %62 = dma.hbm_to_vmem [thread:$0]  %s883_s4, 2048, %s57_s12, [#allocation9], %s730_s7, %s730_s7, %s731_s8  }
  0x44   :  { %721 = dma.done.wait [#allocation3], 128  }
  0x45   :  { %722 = vsyncadd [#allocation3], 4294967168 }
  0x46   :  { %723 = dma.done.wait [#allocation6], 4096  }
  0x47   :  { %724 = vsyncadd [#allocation6], 4294963200 }
  0x48   :  { %725 = dma.done.wait [#allocation9], 2048  }
  0x49   :  { %726 = vsyncadd [#allocation9], 4294965248  ;;  %v735_v0 = vmov 0.0|0.0   ;;  %vm736_vm0 = vmmov 0   ;;  %v737_v1 = vmov 0.0   ;;  %v78_v2 = vld [vmem:[#allocation5] sm:$0xff] }
  0x4a   :  { %529 = vmatprep.subr.bf16.mxu0 %v735_v0  ;;  %456 = vmatprep.mubr.msk.f32.mxu0 %vm736_vm0, %v737_v1  ;;  %v79_v3 = vld [vmem:[#allocation5 + $0x8] sm:$0xff]  ;;  %v80_v4 = vld [vmem:[#allocation5 + $0x10] sm:$0xff]  ;;  %v81_v6 = vld [vmem:[#allocation5 + $0x18] sm:$0xff]  ;;  %s738_s22 = smov [#allocation10]  }
  0x4b   :  { %553 = vmatprep.subr.bf16.mxu1 %v735_v0  ;;  %491 = vmatprep.mubr.msk.f32.mxu1 %vm736_vm0, %v737_v1  ;;  %v530_v5 = vpack.c.bf16 %v79_v3, %v78_v2  ;;  %v533_v7 = vpack.c.bf16 %v81_v6, %v80_v4  ;;  %v82_v8 = vld [vmem:[#allocation5 + $0x20] sm:$0xff]  ;;  %v83_v9 = vld [vmem:[#allocation5 + $0x28] sm:$0xff]  ;;  %v190_v14 = vld [vmem:[#allocation8 + $0x10] sm:$0xff]  ;;  %s360_s23 = sshll.u32 %s738_s22, 4  ;;  %s361_s23 = int_to_ptr.vmem [resolvable:$true] %s360_s23 }
  0x4c   :  { %v188_v10 = vld [vmem:[#allocation8] sm:$0xff]  ;;  %v189_v11 = vld [vmem:[#allocation8 + $0x8] sm:$0xff]  ;;  %v536_v12 = vpack.c.bf16 %v83_v9, %v82_v8  ;;  %v191_v15 = vld [vmem:[#allocation8 + $0x18] sm:$0xff]  ;;  %p704_p5 = scmp.lt.s32.totalorder %s361_s23, %s361_s23 }
  0x4d   :  { %531 = vmatpush3.bf16.msra.mxu0 %v530_v5  ;;  %v554_v13 = vpack.c.bf16 %v189_v11, %v188_v10  ;;  %v84_v16 = vld [vmem:[#allocation5 + $0x30] sm:$0xff]  ;;  %v85_v17 = vld [vmem:[#allocation5 + $0x38] sm:$0xff]  ;;  %v557_v18 = vpack.c.bf16 %v191_v15, %v190_v14  ;;  %v192_v19 = vld [vmem:[#allocation8 + $0x20] sm:$0xff] }
  0x4e   :  { %532 = vmatprep.subr.bf16.mxu0 %v735_v0  ;;  %v193_v20 = vld [vmem:[#allocation8 + $0x28] sm:$0xff]  ;;  %v539_v21 = vpack.c.bf16 %v85_v17, %v84_v16  ;;  %v86_v22 = vld [vmem:[#allocation5 + $0x40] sm:$0xff]  ;;  %v194_v25 = vld [vmem:[#allocation8 + $0x30] sm:$0xff] }
  0x4f   :  { %555 = vmatpush3.bf16.msra.mxu1 %v554_v13  ;;  %v87_v23 = vld [vmem:[#allocation5 + $0x48] sm:$0xff]  ;;  %v560_v24 = vpack.c.bf16 %v193_v20, %v192_v19  ;;  %v195_v26 = vld [vmem:[#allocation8 + $0x38] sm:$0xff]  ;;  %v88_v28 = vld [vmem:[#allocation5 + $0x50] sm:$0xff] }
  0x50   :  { %556 = vmatprep.subr.bf16.mxu1 %v735_v0  ;;  %v542_v27 = vpack.c.bf16 %v87_v23, %v86_v22  ;;  %v89_v29 = vld [vmem:[#allocation5 + $0x58] sm:$0xff]  ;;  %v563_v30 = vpack.c.bf16 %v195_v26, %v194_v25  ;;  %v196_v31 = vld [vmem:[#allocation8 + $0x40] sm:$0xff]  ;;  %v197_v32 = vld [vmem:[#allocation8 + $0x48] sm:$0xff] }
  0x51   :  { %534 = vmatpush3.bf16.msra.mxu0 %v533_v7  ;;  %v545_v33 = vpack.c.bf16 %v89_v29, %v88_v28  ;;  %v90_v34 = vld [vmem:[#allocation5 + $0x60] sm:$0xff]  ;;  %v91_v35 = vld [vmem:[#allocation5 + $0x68] sm:$0xff]  ;;  %v566_v36 = vpack.c.bf16 %v197_v32, %v196_v31  ;;  %v198_v37 = vld [vmem:[#allocation8 + $0x50] sm:$0xff] }
  0x52   :  { %535 = vmatprep.subr.bf16.mxu0 %v735_v0  ;;  %v199_v38 = vld [vmem:[#allocation8 + $0x58] sm:$0xff]  ;;  %v548_v39 = vpack.c.bf16 %v91_v35, %v90_v34  ;;  %v92_v40 = vld [vmem:[#allocation5 + $0x70] sm:$0xff]  ;;  %v200_v43 = vld [vmem:[#allocation8 + $0x60] sm:$0xff] }
  0x53   :  { %558 = vmatpush3.bf16.msra.mxu1 %v557_v18  ;;  %v93_v41 = vld [vmem:[#allocation5 + $0x78] sm:$0xff]  ;;  %v569_v42 = vpack.c.bf16 %v199_v38, %v198_v37  ;;  %v201_v44 = vld [vmem:[#allocation8 + $0x68] sm:$0xff]  ;;  %v172_v46 = vld [vmem:[#allocation7] sm:$0xff] }
  0x54   :  { %559 = vmatprep.subr.bf16.mxu1 %v735_v0  ;;  %v551_v45 = vpack.c.bf16 %v93_v41, %v92_v40  ;;  %v173_v47 = vld [vmem:[#allocation7 + $0x8] sm:$0xff]  ;;  %v572_v48 = vpack.c.bf16 %v201_v44, %v200_v43  ;;  %v77_v49 = vld [vmem:[#allocation2] sm:$0xff]  ;;  %v174_v51 = vld [vmem:[#allocation7 + $0x10] sm:$0xff] }
  0x55   :  { %537 = vmatpush3.bf16.msra.mxu0 %v536_v12  ;;  %v578_v50 = vpack.c.bf16 %v173_v47, %v172_v46  ;;  %v175_v52 = vld [vmem:[#allocation7 + $0x18] sm:$0xff]  ;;  %v176_v54 = vld [vmem:[#allocation7 + $0x20] sm:$0xff]  ;;  %v177_v55 = vld [vmem:[#allocation7 + $0x28] sm:$0xff] }
  0x56   :  { %538 = vmatprep.subr.bf16.mxu0 %v735_v0  ;;  %v581_v53 = vpack.c.bf16 %v175_v52, %v174_v51  ;;  %v584_v56 = vpack.c.bf16 %v177_v55, %v176_v54  ;;  %v178_v57 = vld [vmem:[#allocation7 + $0x30] sm:$0xff]  ;;  %v179_v58 = vld [vmem:[#allocation7 + $0x38] sm:$0xff]  ;;  %v180_v60 = vld [vmem:[#allocation7 + $0x40] sm:$0xff] }
  0x57   :  { %561 = vmatpush3.bf16.msra.mxu1 %v560_v24  ;;  %v587_v59 = vpack.c.bf16 %v179_v58, %v178_v57  ;;  %v181_v61 = vld [vmem:[#allocation7 + $0x48] sm:$0xff]  ;;  %v182_v63 = vld [vmem:[#allocation7 + $0x50] sm:$0xff]  ;;  %v184_v3 = vld [vmem:[#allocation7 + $0x60] sm:$0xff] }
  0x58   :  { %562 = vmatprep.subr.bf16.mxu1 %v735_v0  ;;  %v590_v62 = vpack.c.bf16 %v181_v61, %v180_v60  ;;  %v185_v4 = vld [vmem:[#allocation7 + $0x68] sm:$0xff]  ;;  %v202_v6 = vld [vmem:[#allocation8 + $0x70] sm:$0xff]  ;;  %v203_v7 = vld [vmem:[#allocation8 + $0x78] sm:$0xff] }
  0x59   :  { %540 = vmatpush3.bf16.msra.mxu0 %v539_v21  ;;  %v596_v5 = vpack.c.bf16 %v185_v4, %v184_v3  ;;  %v575_v8 = vpack.c.bf16 %v203_v7, %v202_v6  ;;  %v186_v9 = vld [vmem:[#allocation7 + $0x70] sm:$0xff]  ;;  %v187_v10 = vld [vmem:[#allocation7 + $0x78] sm:$0xff] }
  0x5a   :  { %541 = vmatprep.subr.bf16.mxu0 %v735_v0  ;;  %v599_v11 = vpack.c.bf16 %v187_v10, %v186_v9  ;;  %v371_v12 = vld [vmem:[%s881_s2] ss:$0 sm:$0xff]  ;;  %s699_s2 = scalar_lea.vmem %s361_s23, 128 }
  0x5b   :  { %564 = vmatpush3.bf16.msra.mxu1 %v563_v30  ;;  %v372_v19 = vld [vmem:[%s884_s5] ss:$0 sm:$0xff]  ;;  %p700_p4 = scmp.ne.s32.totalorder %s361_s23, %s699_s2  ;;  %p705_p6 = scmp.lt.s32.totalorder %s699_s2, %s699_s2 }
  0x5c   :  { %565 = vmatprep.subr.bf16.mxu1 %v735_v0 }
  0x5d   :  { %543 = vmatpush3.bf16.msra.mxu0 %v542_v27  ;;  %p706_p7 = por %p705_p6, %p704_p5 }
  0x5e   :  { %544 = vmatprep.subr.bf16.mxu0 %v735_v0 }
  0x5f   :  { %567 = vmatpush3.bf16.msra.mxu1 %v566_v36  ;;  %p707_p8 = pnand %p706_p7, %p700_p4 }
  0x60   :  { %568 = vmatprep.subr.bf16.mxu1 %v735_v0 }
  0x61   :  { %546 = vmatpush3.bf16.msra.mxu0 %v545_v33 }
  0x62   :  { %547 = vmatprep.subr.bf16.mxu0 %v735_v0 }
  0x63   :  { %570 = vmatpush3.bf16.msra.mxu1 %v569_v42 }
  0x64   :  { %571 = vmatprep.subr.bf16.mxu1 %v735_v0 }
  0x65   :  { %549 = vmatpush3.bf16.msra.mxu0 %v548_v39 }
  0x66   :  { %550 = vmatprep.subr.bf16.mxu0 %v735_v0 }
  0x67   :  { %573 = vmatpush3.bf16.msra.mxu1 %v572_v48 }
  0x68   :  { %574 = vmatprep.subr.bf16.mxu1 %v735_v0 }
  0x69   :  { %552 = vmatpush3.bf16.msra.mxu0 %v551_v45 }
  0x6a   :  { %577 = vmatprep.subr.bf16.mxu0 %v735_v0 }
  0x6b   :  { %576 = vmatpush3.bf16.msra.mxu1 %v575_v8 }
  0x6c   :  { %457 = vmatmul.mubr.f32.vlgmr.msra.gmra.mrb[0].mxu0 %v77_v49 }
  0x6d   :  { %579 = vmatpush3.bf16.msra.mxu0 %v578_v50  ;;  %526 = vmatprep.mubr.msk.f32.mxu0 %vm736_vm0, %v737_v1  ;;  %v183_v1 = vld [vmem:[#allocation7 + $0x58] sm:$0xff] }
  0x6e   :  { %580 = vmatprep.subr.bf16.mxu0 %v735_v0  ;;  %v593_v2 = vpack.c.bf16 %v183_v1, %v182_v63  ;;  %492 = vmatmul.mubr.f32.vlgmr.msra.gmra.mrb[0].mxu1 %v77_v49 }
  0x71   :  { %582 = vmatpush3.bf16.msra.mxu0 %v581_v53 }
  0x72   :  { %583 = vmatprep.subr.bf16.mxu0 %v735_v0 }
  0x75   :  { %585 = vmatpush3.bf16.msra.mxu0 %v584_v56 }
  0x76   :  { %586 = vmatprep.subr.bf16.mxu0 %v735_v0 }
  0x79   :  { %588 = vmatpush3.bf16.msra.mxu0 %v587_v59 }
  0x7a   :  { %589 = vmatprep.subr.bf16.mxu0 %v735_v0 }
  0x7d   :  { %591 = vmatpush3.bf16.msra.mxu0 %v590_v62 }
  0x7e   :  { %592 = vmatprep.subr.bf16.mxu0 %v735_v0 }
  0x81   :  { %594 = vmatpush3.bf16.msra.mxu0 %v593_v2 }
  0x82   :  { %595 = vmatprep.subr.bf16.mxu0 %v735_v0 }
  0x85   :  { %597 = vmatpush3.bf16.msra.mxu0 %v596_v5 }
  0x86   :  { %598 = vmatprep.subr.bf16.mxu0 %v735_v0 }
  0x89   :  { %600 = vmatpush3.bf16.msra.mxu0 %v599_v11 }
 0x13f   :  { %v167_v13 = vpop.f32.mrb[0].mxu0 }
 0x140   :  { %v168_v14 = vadd.f32 %v371_v12, %v167_v13  ;;  %v458_v15 = vpop.f32.mrb[1].mxu0 }
 0x141   :  { %v270_v17 = vpop.f32.mrb[0].mxu1 }
 0x142   :  { %v171_v16 = vmax.f32 %v168_v14, 0.0  ;;  %v493_v0 = vpop.f32.mrb[1].mxu1 }
 0x144   :  { %527 = vmatmul.mubr.f32.vlgmr.msra.gmra.mrb[2].mxu0 %v171_v16 }
 0x217   :  { %v340_v18 = vpop.f32.mrb[2].mxu0 }
 0x218   :  { %v341_v20 = vadd.f32 %v340_v18, %v270_v17  ;;  %v528_v21 = vpop.f32.mrb[3].mxu0 }
 0x21a   :  { %v351_v22 = vadd.f32 %v372_v19, %v341_v20 }
 0x21c   :  { %v352_v23 = vmax.f32 %v351_v22, 0.0 }
 0x21e   :  { %353 = vst [vmem:[#allocation10] sm:$0xff] %v352_v23 }
 0x21f   :  { %710 = shalt.err (!%p707_p8)
}
 0x220   :  { %s711_s26 = scalar_lea.hbm %s885_s6, 128 }
 0x221   :  { %p712_p9 = scmp.ne.s32.totalorder %s885_s6, %s711_s26  ;;  %p715_p10 = scmp.lt.u32.totalorder %s711_s26, %s885_s6 }
 0x223   :  { %p717_p11 = pnand %p715_p10, %p712_p9 }
 0x225   :  { %720 = shalt.err (!%p717_p11)
}
 0x226   :  { %363 = dma.vmem_to_hbm [thread:$0]  %s361_s23, 128, %s885_s6, [#allocation4]  }
 0x227   :  { %727 = dma.done.wait [#allocation4], 128  }
 0x228   :  { %728 = vsyncadd [#allocation4], 4294967168 }
 0x229   :  { %367 = vsyncpa [#allocation3], 1 }
 0x22a   :  { %368 = vsyncpa [#allocation6], 1 }
 0x22b   :  { %369 = vsyncpa [#allocation9], 1 }
 0x22c   :  { %370 = vsyncpa [#allocation4], 1 }

</bundles_post_ra>
